<compile_context>
chip_gen: v5e
topology: v5e:2x2
jax: 0.10.0
libtpu: 0.0.40
codegen_flags: <defaults>
</compile_context>

<pallas_src>
import jax
import jax.numpy as jnp
from jax.experimental import pallas as pl
from jax.experimental.pallas import tpu as pltpu


def _round_up(x, m):
    return -(-x // m) * m


# ---------------------------------------------------------------------------
# Kernel body
# ---------------------------------------------------------------------------
def _global_pool_compute(node_ref, mask_ref, gfeat_ref, w_ref, v_ref, b_ref):
    """Shared kernel body. Returns (new_graph_feats (Gb,F), node_weights (Gb,N))."""
    F = gfeat_ref.shape[-1]

    nodes = node_ref[...].astype(jnp.float32)   # (Gb, N, F) (may stream as bf16)
    mask = mask_ref[...]                        # (Gb, N)   1.0 for valid nodes
    h = gfeat_ref[...]                          # (Gb, F)   graph feature / GRU hidden
    w = w_ref[...]                              # (F, 7F)  [wproj | wxr wxz wxn | whr whz whn]
    v = v_ref[...]                              # (4, F)   [wlog_g; wlog_n; bproj; blog(bcast)]
    b = b_ref[...]                              # (2, 3F)  [bir|biz|bin ; bhr|bhz|bhn]

    wlog_g = v[0:1, :]                          # (1, F)
    wlog_n = v[1:2, :]                          # (1, F)
    bproj = v[2:3, :]                           # (1, F)
    blog = v[3:4, 0:1]                          # (1, 1)

    # compute_logits(cat([broadcast_nodes(relu(g_feats)), node_feats])):
    # Linear(2F -> 1) + LeakyReLU(0.01); the concat is folded into two partial
    # dot products (wlog_g for the broadcast half, wlog_n for the node half).
    g_relu = jnp.maximum(h, 0.0)
    z_g = jnp.sum(g_relu * wlog_g, axis=-1, keepdims=True)             # (Gb, 1)
    z_n = jnp.sum(nodes * wlog_n[None, :, :], axis=-1)                 # (Gb, N)
    z = z_n + z_g + blog                                               # (Gb, N)
    z = jnp.where(z > 0, z, 0.01 * z)                                  # LeakyReLU

    # softmax_nodes: masked per-graph softmax over the node (lane) axis.
    z_m = jnp.where(mask > 0, z, jnp.float32(-1e30))
    z_max = jnp.max(z_m, axis=-1, keepdims=True)                       # (Gb, 1)
    e = jnp.exp(z_m - z_max) * mask
    denom = jnp.sum(e, axis=-1, keepdims=True)                         # (Gb, 1)
    inv = pl.reciprocal(jnp.maximum(denom, jnp.float32(1e-30)), approx=True)
    a = e * inv                                                        # (Gb, N)

    # Softmax weights sum to exactly 1 for any graph with >= 1 valid node, so
    # the bias scale is an indicator (no extra reduce, no approx-recip drift).
    a_sum = jnp.where(denom > 0.0, 1.0, 0.0)                           # (Gb, 1)

    # project_nodes (Dropout eval-identity + Linear) followed by weighted
    # sum_nodes; folded by linearity:
    #   sum_n a_n (x_n W + b) == (sum_n a_n x_n) W + (sum_n a_n) b
    # TODO(synk): dropout omitted (eval-mode identity); add PRNG masking for training.
    a3 = jnp.expand_dims(a, axis=-1)                                   # (Gb, N, 1)
    w_nodes = jnp.sum(a3 * nodes, axis=1)                              # (Gb, F)
    wproj = w[:, 0:F]
    g_repr = (jnp.dot(w_nodes, wproj, preferred_element_type=jnp.float32)
              + a_sum * bproj)                                         # (Gb, F)
    context = jnp.where(g_repr > 0, g_repr,
                        jnp.exp(jnp.minimum(g_repr, 0.0)) - 1.0)       # ELU(alpha=1)

    # GRUCell(context, g_feats); 6 per-gate matmuls fused into 2 (F,3F) matmuls.
    wx = w[:, F:4 * F]                                                 # (F, 3F)
    wh = w[:, 4 * F:7 * F]                                             # (F, 3F)
    xW = jnp.dot(context, wx, preferred_element_type=jnp.float32) + b[0:1, :]  # (Gb,3F)
    hW = jnp.dot(h, wh, preferred_element_type=jnp.float32) + b[1:2, :]        # (Gb,3F)
    r = jax.nn.sigmoid(xW[:, 0:F] + hW[:, 0:F])
    zg = jax.nn.sigmoid(xW[:, F:2 * F] + hW[:, F:2 * F])
    n = jnp.tanh(xW[:, 2 * F:3 * F] + r * hW[:, 2 * F:3 * F])
    new_h = (1.0 - zg) * n + zg * h                                    # (Gb, F)
    return new_h, a


def _kernel_with_weights(node_ref, mask_ref, gfeat_ref, w_ref, v_ref, b_ref,
                         out_g_ref, out_a_ref):
    new_h, a = _global_pool_compute(node_ref, mask_ref, gfeat_ref, w_ref, v_ref, b_ref)
    out_g_ref[...] = new_h
    out_a_ref[...] = a


def _kernel_no_weights(node_ref, mask_ref, gfeat_ref, w_ref, v_ref, b_ref, out_g_ref):
    new_h, _ = _global_pool_compute(node_ref, mask_ref, gfeat_ref, w_ref, v_ref, b_ref)
    out_g_ref[...] = new_h


# ---------------------------------------------------------------------------
# Parameter / input preparation (one-time, dataset-build-style)
# ---------------------------------------------------------------------------
def init_params(key, feat_size):
    """Deterministic synthetic parameters matching the PyTorch module shapes."""
    F = feat_size
    ks = jax.random.split(key, 16)
    s = 0.1
    return {
        # compute_logits: Linear(2F, 1) split into [broadcast-half, node-half]
        "wlog_g": jax.random.normal(ks[0], (1, F), jnp.float32) * s,
        "wlog_n": jax.random.normal(ks[1], (1, F), jnp.float32) * s,
        "blog":   jax.random.normal(ks[2], (1, 1), jnp.float32) * s,
        # project_nodes: Linear(F, F)   (stored transposed: x @ W)
        "wproj":  jax.random.normal(ks[3], (F, F), jnp.float32) * s,
        "bproj":  jax.random.normal(ks[4], (1, F), jnp.float32) * s,
        # GRUCell(F, F): per-gate transposed weight matrices + biases
        "wxr": jax.random.normal(ks[5], (F, F), jnp.float32) * s,
        "wxz": jax.random.normal(ks[6], (F, F), jnp.float32) * s,
        "wxn": jax.random.normal(ks[7], (F, F), jnp.float32) * s,
        "whr": jax.random.normal(ks[8], (F, F), jnp.float32) * s,
        "whz": jax.random.normal(ks[9], (F, F), jnp.float32) * s,
        "whn": jax.random.normal(ks[10], (F, F), jnp.float32) * s,
        "bir": jax.random.normal(ks[11], (1, F), jnp.float32) * s,
        "biz": jax.random.normal(ks[12], (1, F), jnp.float32) * s,
        "bin": jax.random.normal(ks[13], (1, F), jnp.float32) * s,
        "bhr": jax.random.normal(ks[14], (1, F), jnp.float32) * s,
        "bhz": jax.random.normal(ks[15], (1, F), jnp.float32) * s,
        "bhn": jnp.zeros((1, F), jnp.float32),
    }


def pack_params(params, feat_size, feat_pad=None):
    """Zero-pad every parameter to a lane-dense feature dim (multiple of 128)
    and stack the 18 small parameters into 3 kernel inputs.  Do this once."""
    F = feat_size
    Fp = feat_pad if feat_pad is not None else _round_up(F, 128)

    def padw(x):   # (F, F) -> (Fp, Fp)
        return jnp.pad(x, ((0, Fp - F), (0, Fp - F)))

    def padv(x):   # (1, F) -> (1, Fp)
        return jnp.pad(x, ((0, 0), (0, Fp - F)))

    w_all = jnp.concatenate(
        [padw(params["wproj"]), padw(params["wxr"]), padw(params["wxz"]),
         padw(params["wxn"]), padw(params["whr"]), padw(params["whz"]),
         padw(params["whn"])], axis=1)                                   # (Fp, 7Fp)
    vecs = jnp.concatenate(
        [padv(params["wlog_g"]), padv(params["wlog_n"]), padv(params["bproj"]),
         jnp.full((1, Fp), params["blog"][0, 0], jnp.float32)], axis=0)  # (4, Fp)
    b_gru = jnp.concatenate(
        [jnp.concatenate([padv(params["bir"]), padv(params["biz"]),
                          padv(params["bin"])], axis=1),
         jnp.concatenate([padv(params["bhr"]), padv(params["bhz"]),
                          padv(params["bhn"])], axis=1)], axis=0)        # (2, 3Fp)
    return w_all, vecs, b_gru


def choose_graphs_per_block(G, graphs_per_block=128):
    """Sublane-friendly per-block graph count; guarantees >= 2 grid steps for
    batches larger than one block (v7x has 2 TensorCores)."""
    if G <= 8:
        return G                       # tiny batch: one block, dims == full array
    half = _round_up((G + 1) // 2, 8)  # cap at ~half the batch -> >= 2 grid steps
    return max(8, min(_round_up(graphs_per_block, 8), half))


def prepare_inputs(node_feats, mask, g_feats, feat_pad,
                   graphs_per_block=128, node_dtype=None):
    """One-time data prep (do at dataset-build time, NOT per kernel call):
    pad F to a lane-dense multiple of 128, N to a sublane multiple of 8, and G
    to a multiple of the per-block graph count.  Optionally downcast the big
    node tensor (e.g. bfloat16) to halve its HBM traffic."""
    G, N, F = node_feats.shape
    Np = _round_up(N, 8)
    gb = choose_graphs_per_block(G, graphs_per_block)
    Gp = _round_up(G, gb)
    node_p = jnp.pad(node_feats, ((0, Gp - G), (0, Np - N), (0, feat_pad - F)))
    if node_dtype is not None:
        node_p = node_p.astype(node_dtype)
    mask_p = jnp.pad(mask.reshape(G, N).astype(jnp.float32),
                     ((0, Gp - G), (0, Np - N)))
    g_p = jnp.pad(g_feats, ((0, Gp - G), (0, feat_pad - F)))
    return node_p, mask_p, g_p, gb


# ---------------------------------------------------------------------------
# pallas_call wrapper (expects pre-padded inputs; never pads itself)
# ---------------------------------------------------------------------------
def global_pool(node_feats, mask, g_feats, packed_params, gb, get_node_weight=False):
    G, N, F = node_feats.shape
    w_all, vecs, b_gru = packed_params
    assert F % 128 == 0 and N % 8 == 0 and G % gb == 0, \
        "inputs must be padded via prepare_inputs()/pack_params() first"
    assert gb % 8 == 0 or gb == G
    assert w_all.shape == (F, 7 * F)

    grid = (G // gb,)
    nbytes = node_feats.dtype.itemsize

    in_specs = [
        pl.BlockSpec((gb, N, F), lambda g: (g, 0, 0)),   # node_feats (f32 or bf16)
        pl.BlockSpec((gb, N), lambda g: (g, 0)),         # mask (lane-dense)
        pl.BlockSpec((gb, F), lambda g: (g, 0)),         # g_feats
        pl.BlockSpec((F, 7 * F), lambda g: (0, 0)),      # stacked (F,F) weights
        pl.BlockSpec((4, F), lambda g: (0, 0)),          # stacked (1,F) vectors + blog
        pl.BlockSpec((2, 3 * F), lambda g: (0, 0)),      # stacked GRU biases
    ]

    if get_node_weight:
        kernel = _kernel_with_weights
        out_specs = [pl.BlockSpec((gb, F), lambda g: (g, 0)),
                     pl.BlockSpec((gb, N), lambda g: (g, 0))]
        out_shape = [jax.ShapeDtypeStruct((G, F), jnp.float32),
                     jax.ShapeDtypeStruct((G, N), jnp.float32)]
    else:
        kernel = _kernel_no_weights
        out_specs = pl.BlockSpec((gb, F), lambda g: (g, 0))
        out_shape = jax.ShapeDtypeStruct((G, F), jnp.float32)

    # Size the scoped VMEM limit from the actual double-buffered block footprint
    # (v5e default is only 16 MiB; v7x physical VMEM is 64 MiB).
    out_a_bytes = gb * N * 4 if get_node_weight else 0
    block_bytes = (gb * N * F * nbytes + gb * N * 4 + gb * F * 4   # inputs
                   + gb * F * 4 + out_a_bytes)                     # outputs
    weight_bytes = (F * 7 * F + 4 * F + 2 * 3 * F) * 4
    vmem_limit = int(min(max(2 * (block_bytes + weight_bytes) + (4 << 20), 16 << 20),
                         64 << 20))

    cost = pl.CostEstimate(
        flops=int(2 * G * (2 * N * F + 7 * F * F)),
        transcendentals=int(G * (N + 6 * F)),
        bytes_accessed=int(G * N * F * nbytes + G * N * 4 + 2 * G * F * 4
                           + weight_bytes + (G * N * 4 if get_node_weight else 0)),
    )

    return pl.pallas_call(
        kernel,
        out_shape=out_shape,
        grid_spec=pltpu.PrefetchScalarGridSpec(
            num_scalar_prefetch=0,
            grid=grid,
            in_specs=in_specs,
            out_specs=out_specs,
        ),
        compiler_params=pltpu.CompilerParams(
            dimension_semantics=("parallel",),
            vmem_limit_bytes=vmem_limit),
        cost_estimate=cost,
    )(node_feats, mask, g_feats, w_all, vecs, b_gru)


# ---------------------------------------------------------------------------
# Pure-JAX reference (mirrors the PyTorch module, eval mode)
# ---------------------------------------------------------------------------
def global_pool_reference(node_feats, mask, g_feats, params):
    G, N, F = node_feats.shape
    mask3 = mask.reshape(G, N, 1).astype(jnp.float32)
    g_relu = jax.nn.relu(g_feats)
    z = ((g_relu @ params["wlog_g"].T)[:, None, :]
         + node_feats @ params["wlog_n"].T + params["blog"][0, 0])
    z = jnp.where(z > 0, z, 0.01 * z)
    z_m = jnp.where(mask3 > 0, z, -1e30)
    z_max = jnp.max(z_m, axis=1, keepdims=True)
    e = jnp.exp(z_m - z_max) * mask3
    a = e / jnp.maximum(jnp.sum(e, axis=1, keepdims=True), 1e-30)
    hv = node_feats @ params["wproj"] + params["bproj"]
    g_repr = jnp.sum(a * hv, axis=1)
    context = jnp.where(g_repr > 0, g_repr, jnp.exp(g_repr) - 1.0)
    x, h = context, g_feats
    r = jax.nn.sigmoid(x @ params["wxr"] + params["bir"] + h @ params["whr"] + params["bhr"])
    zg = jax.nn.sigmoid(x @ params["wxz"] + params["biz"] + h @ params["whz"] + params["bhz"])
    n = jnp.tanh(x @ params["wxn"] + params["bin"] + r * (h @ params["whn"] + params["bhn"]))
    new_h = (1.0 - zg) * n + zg * h
    return new_h, a


if __name__ == "__main__":
    key = jax.random.PRNGKey(0)
    k_node, k_g, k_param, k_len, k_node2, k_g2 = jax.random.split(key, 6)

    F = 32                                  # module feat_size (padded to 128 lanes)
    params = init_params(k_param, F)
    packed = pack_params(params, F)
    Fp = packed[0].shape[0]

    # --- case 1: tiny batch (2 graphs, up to 8 nodes each), f32 streaming ----
    G, N = 2, 8
    node_feats = jax.random.normal(k_node, (G, N, F), jnp.float32)
    g_feats = jax.random.normal(k_g, (G, F), jnp.float32)
    mask = jnp.array([[1, 1, 1, 1, 1, 1, 0, 0],     # graph 0: 6 real nodes
                      [1, 1, 1, 1, 1, 1, 1, 1]], jnp.float32)

    node_p, mask_p, g_p, gb = prepare_inputs(node_feats, mask, g_feats, Fp)
    new_g_p, a_p = global_pool(node_p, mask_p, g_p, packed, gb, get_node_weight=True)
    new_g_only_p = global_pool(node_p, mask_p, g_p, packed, gb, get_node_weight=False)
    jax.block_until_ready((new_g_p, a_p, new_g_only_p))

    new_g = new_g_p[:G, :F]
    a = a_p[:G, :N].reshape(G, N, 1)                 # per-node weight column, as in PyTorch
    new_g_only = new_g_only_p[:G, :F]
    assert new_g.shape == (G, F) and a.shape == (G, N, 1) and new_g_only.shape == (G, F)

    ref_g, ref_a = global_pool_reference(node_feats, mask, g_feats, params)
    assert jnp.allclose(new_g, ref_g, rtol=1e-2, atol=1e-2)
    assert jnp.allclose(a.reshape(G, N), ref_a.reshape(G, N), rtol=1e-2, atol=1e-2)
    assert jnp.allclose(new_g_only, ref_g, rtol=1e-2, atol=1e-2)

    # --- case 2: larger batch exercising N/G padding and a 2-step grid -------
    G2, N2 = 20, 10
    node_feats2 = jax.random.normal(k_node2, (G2, N2, F), jnp.float32)
    g_feats2 = jax.random.normal(k_g2, (G2, F), jnp.float32)
    lens = jax.random.randint(k_len, (G2,), 1, N2 + 1)
    mask2 = (jnp.arange(N2)[None, :] < lens[:, None]).astype(jnp.float32)

    node_p2, mask_p2, g_p2, gb2 = prepare_inputs(node_feats2, mask2, g_feats2, Fp,
                                                 graphs_per_block=16)
    new_g2_p, a2_p = global_pool(node_p2, mask_p2, g_p2, packed, gb2,
                                 get_node_weight=True)
    jax.block_until_ready((new_g2_p, a2_p))
    ref_g2, ref_a2 = global_pool_reference(node_feats2, mask2, g_feats2, params)
    assert jnp.allclose(new_g2_p[:G2, :F], ref_g2, rtol=1e-2, atol=1e-2)
    assert jnp.allclose(a2_p[:G2, :N2], ref_a2.reshape(G2, N2), rtol=1e-2, atol=1e-2)

    # --- case 3: bfloat16 streaming of the node tensor (halves HBM bytes) ----
    node_p3, mask_p3, g_p3, gb3 = prepare_inputs(node_feats, mask, g_feats, Fp,
                                                 node_dtype=jnp.bfloat16)
    new_g3_p = global_pool(node_p3, mask_p3, g_p3, packed, gb3, get_node_weight=False)
    jax.block_until_ready(new_g3_p)
    assert jnp.allclose(new_g3_p[:G, :F], ref_g, rtol=5e-2, atol=5e-2)

    print("KERNEL_OK")
</pallas_src>

<mosaic_0001>
module attributes {stable_mosaic.version = 11 : i64} {
  func.func @_kernel_with_weights(%arg0: i32, %arg1: memref<2x8x128xf32, #tpu.memory_space<vmem>>, %arg2: memref<2x8xf32, #tpu.memory_space<vmem>>, %arg3: memref<2x128xf32, #tpu.memory_space<vmem>>, %arg4: memref<128x896xf32, #tpu.memory_space<vmem>>, %arg5: memref<4x128xf32, #tpu.memory_space<vmem>>, %arg6: memref<2x384xf32, #tpu.memory_space<vmem>>, %arg7: memref<2x128xf32, #tpu.memory_space<vmem>>, %arg8: memref<2x8xf32, #tpu.memory_space<vmem>>) attributes {dimension_semantics = [#tpu.dimension_semantics<parallel>], iteration_bounds = array<i64: 1>, scalar_prefetch = 0 : i64, scratch_operands = 0 : i64, tpu.core_type = #tpu.core_type<tc>, window_params = [{transform_indices = @transform_0, window_bounds = array<i64: 2, 8, 128>}, {transform_indices = @transform_1, window_bounds = array<i64: 2, 8>}, {transform_indices = @transform_2, window_bounds = array<i64: 2, 128>}, {pipeline_mode = #tpu.pipeline_mode<synchronous>, transform_indices = @transform_3, window_bounds = array<i64: 128, 896>}, {pipeline_mode = #tpu.pipeline_mode<synchronous>, transform_indices = @transform_4, window_bounds = array<i64: 4, 128>}, {pipeline_mode = #tpu.pipeline_mode<synchronous>, transform_indices = @transform_5, window_bounds = array<i64: 2, 384>}, {transform_indices = @transform_6, window_bounds = array<i64: 2, 128>}, {transform_indices = @transform_7, window_bounds = array<i64: 2, 8>}]} {
    %c0 = arith.constant 0 : index
    %c0_0 = arith.constant 0 : index
    %c0_1 = arith.constant 0 : index
    %0 = vector.load %arg1[%c0, %c0_0, %c0_1] : memref<2x8x128xf32, #tpu.memory_space<vmem>>, vector<2x8x128xf32>
    %c0_2 = arith.constant 0 : index
    %c0_3 = arith.constant 0 : index
    %1 = vector.load %arg2[%c0_2, %c0_3] : memref<2x8xf32, #tpu.memory_space<vmem>>, vector<2x8xf32>
    %c0_4 = arith.constant 0 : index
    %c0_5 = arith.constant 0 : index
    %2 = vector.load %arg3[%c0_4, %c0_5] : memref<2x128xf32, #tpu.memory_space<vmem>>, vector<2x128xf32>
    %c0_6 = arith.constant 0 : index
    %c0_7 = arith.constant 0 : index
    %3 = vector.load %arg4[%c0_6, %c0_7] : memref<128x896xf32, #tpu.memory_space<vmem>>, vector<128x896xf32>
    %c0_8 = arith.constant 0 : index
    %c0_9 = arith.constant 0 : index
    %4 = vector.load %arg5[%c0_8, %c0_9] : memref<4x128xf32, #tpu.memory_space<vmem>>, vector<4x128xf32>
    %c0_10 = arith.constant 0 : index
    %c0_11 = arith.constant 0 : index
    %5 = vector.load %arg6[%c0_10, %c0_11] : memref<2x384xf32, #tpu.memory_space<vmem>>, vector<2x384xf32>
    %6 = vector.extract_strided_slice %4 {offsets = [0, 0], sizes = [1, 128], strides = [1, 1]} : vector<4x128xf32> to vector<1x128xf32>
    %7 = vector.extract_strided_slice %4 {offsets = [1, 0], sizes = [1, 128], strides = [1, 1]} : vector<4x128xf32> to vector<1x128xf32>
    %8 = vector.extract_strided_slice %4 {offsets = [2, 0], sizes = [1, 128], strides = [1, 1]} : vector<4x128xf32> to vector<1x128xf32>
    %9 = vector.extract_strided_slice %4 {offsets = [3, 0], sizes = [1, 1], strides = [1, 1]} : vector<4x128xf32> to vector<1x1xf32>
    %cst = arith.constant 0.000000e+00 : f32
    %10 = vector.broadcast %cst : f32 to vector<2x128xf32>
    %11 = arith.maximumf %2, %10 : vector<2x128xf32>
    %12 = vector.broadcast %6 : vector<1x128xf32> to vector<2x128xf32>
    %13 = arith.mulf %11, %12 : vector<2x128xf32>
    %cst_12 = arith.constant dense<0.000000e+00> : vector<2xf32>
    %14 = vector.multi_reduction <add>, %13, %cst_12 [1] : vector<2x128xf32> to vector<2xf32>
    %15 = vector.shape_cast %14 : vector<2xf32> to vector<2x1xf32>
    %16 = vector.shape_cast %7 : vector<1x128xf32> to vector<1x1x128xf32>
    %17 = vector.broadcast %16 : vector<1x1x128xf32> to vector<2x8x128xf32>
    %18 = arith.mulf %0, %17 : vector<2x8x128xf32>
    %cst_13 = arith.constant dense<0.000000e+00> : vector<2x8xf32>
    %19 = vector.multi_reduction <add>, %18, %cst_13 [2] : vector<2x8x128xf32> to vector<2x8xf32>
    %20 = vector.broadcast %15 : vector<2x1xf32> to vector<2x8xf32>
    %21 = arith.addf %19, %20 : vector<2x8xf32>
    %22 = vector.broadcast %9 : vector<1x1xf32> to vector<2x8xf32>
    %23 = arith.addf %21, %22 : vector<2x8xf32>
    %cst_14 = arith.constant 0.000000e+00 : f32
    %24 = vector.broadcast %cst_14 : f32 to vector<2x8xf32>
    %25 = arith.cmpf ogt, %23, %24 : vector<2x8xf32>
    %cst_15 = arith.constant 0.00999999977 : f32
    %26 = vector.broadcast %cst_15 : f32 to vector<2x8xf32>
    %27 = arith.mulf %26, %23 : vector<2x8xf32>
    %28 = arith.select %25, %23, %27 : vector<2x8xi1>, vector<2x8xf32>
    %cst_16 = arith.constant 0.000000e+00 : f32
    %29 = vector.broadcast %cst_16 : f32 to vector<2x8xf32>
    %30 = arith.cmpf ogt, %1, %29 : vector<2x8xf32>
    %cst_17 = arith.constant -1.000000e+30 : f32
    %31 = vector.broadcast %cst_17 : f32 to vector<2x8xf32>
    %32 = arith.select %30, %28, %31 : vector<2x8xi1>, vector<2x8xf32>
    %cst_18 = arith.constant dense<0xFF800000> : vector<2xf32>
    %33 = vector.multi_reduction <maximumf>, %32, %cst_18 [1] : vector<2x8xf32> to vector<2xf32>
    %34 = vector.shape_cast %33 : vector<2xf32> to vector<2x1xf32>
    %35 = vector.broadcast %34 : vector<2x1xf32> to vector<2x8xf32>
    %36 = arith.subf %32, %35 : vector<2x8xf32>
    %37 = math.exp %36 : vector<2x8xf32>
    %38 = arith.mulf %37, %1 : vector<2x8xf32>
    %cst_19 = arith.constant dense<0.000000e+00> : vector<2xf32>
    %39 = vector.multi_reduction <add>, %38, %cst_19 [1] : vector<2x8xf32> to vector<2xf32>
    %40 = vector.shape_cast %39 : vector<2xf32> to vector<2x1xf32>
    %cst_20 = arith.constant 1.000000e-30 : f32
    %41 = vector.broadcast %cst_20 : f32 to vector<2x1xf32>
    %42 = arith.maximumf %40, %41 : vector<2x1xf32>
    %43 = tpu.reciprocal %42 {approx = true} : vector<2x1xf32> -> vector<2x1xf32>
    %44 = vector.broadcast %43 : vector<2x1xf32> to vector<2x8xf32>
    %45 = arith.mulf %38, %44 : vector<2x8xf32>
    %cst_21 = arith.constant 0.000000e+00 : f32
    %46 = vector.broadcast %cst_21 : f32 to vector<2x1xf32>
    %47 = arith.cmpf ogt, %40, %46 : vector<2x1xf32>
    %cst_22 = arith.constant 1.000000e+00 : f32
    %cst_23 = arith.constant 0.000000e+00 : f32
    %48 = vector.broadcast %cst_22 : f32 to vector<2x1xf32>
    %49 = vector.broadcast %cst_23 : f32 to vector<2x1xf32>
    %50 = arith.select %47, %48, %49 : vector<2x1xi1>, vector<2x1xf32>
    %51 = vector.shape_cast %45 : vector<2x8xf32> to vector<2x8x1xf32>
    %52 = vector.broadcast %51 : vector<2x8x1xf32> to vector<2x8x128xf32>
    %53 = arith.mulf %52, %0 : vector<2x8x128xf32>
    %cst_24 = arith.constant dense<0.000000e+00> : vector<2x128xf32>
    %54 = vector.multi_reduction <add>, %53, %cst_24 [1] : vector<2x8x128xf32> to vector<2x128xf32>
    %55 = vector.extract_strided_slice %3 {offsets = [0, 0], sizes = [128, 128], strides = [1, 1]} : vector<128x896xf32> to vector<128x128xf32>
    %cst_25 = arith.constant dense<0.000000e+00> : vector<2x128xf32>
    %56 = tpu.matmul %54, %55, %cst_25 {dimension_numbers = #tpu.dot_dimension_numbers<[1], [0], [0], [1], [0, 0, 1, 1], [], []>} : vector<2x128xf32>, vector<128x128xf32>, vector<2x128xf32> -> vector<2x128xf32>
    %57 = vector.broadcast %50 : vector<2x1xf32> to vector<2x128xf32>
    %58 = vector.broadcast %8 : vector<1x128xf32> to vector<2x128xf32>
    %59 = arith.mulf %57, %58 : vector<2x128xf32>
    %60 = arith.addf %56, %59 : vector<2x128xf32>
    %cst_26 = arith.constant 0.000000e+00 : f32
    %61 = vector.broadcast %cst_26 : f32 to vector<2x128xf32>
    %62 = arith.cmpf ogt, %60, %61 : vector<2x128xf32>
    %cst_27 = arith.constant 0.000000e+00 : f32
    %63 = vector.broadcast %cst_27 : f32 to vector<2x128xf32>
    %64 = arith.minimumf %60, %63 : vector<2x128xf32>
    %65 = math.exp %64 : vector<2x128xf32>
    %cst_28 = arith.constant 1.000000e+00 : f32
    %66 = vector.broadcast %cst_28 : f32 to vector<2x128xf32>
    %67 = arith.subf %65, %66 : vector<2x128xf32>
    %68 = arith.select %62, %60, %67 : vector<2x128xi1>, vector<2x128xf32>
    %69 = vector.extract_strided_slice %3 {offsets = [0, 128], sizes = [128, 384], strides = [1, 1]} : vector<128x896xf32> to vector<128x384xf32>
    %70 = vector.extract_strided_slice %3 {offsets = [0, 512], sizes = [128, 384], strides = [1, 1]} : vector<128x896xf32> to vector<128x384xf32>
    %cst_29 = arith.constant dense<0.000000e+00> : vector<2x384xf32>
    %71 = tpu.matmul %68, %69, %cst_29 {dimension_numbers = #tpu.dot_dimension_numbers<[1], [0], [0], [1], [0, 0, 1, 1], [], []>} : vector<2x128xf32>, vector<128x384xf32>, vector<2x384xf32> -> vector<2x384xf32>
    %72 = vector.extract_strided_slice %5 {offsets = [0, 0], sizes = [1, 384], strides = [1, 1]} : vector<2x384xf32> to vector<1x384xf32>
    %73 = vector.broadcast %72 : vector<1x384xf32> to vector<2x384xf32>
    %74 = arith.addf %71, %73 : vector<2x384xf32>
    %cst_30 = arith.constant dense<0.000000e+00> : vector<2x384xf32>
    %75 = tpu.matmul %2, %70, %cst_30 {dimension_numbers = #tpu.dot_dimension_numbers<[1], [0], [0], [1], [0, 0, 1, 1], [], []>} : vector<2x128xf32>, vector<128x384xf32>, vector<2x384xf32> -> vector<2x384xf32>
    %76 = vector.extract_strided_slice %5 {offsets = [1, 0], sizes = [1, 384], strides = [1, 1]} : vector<2x384xf32> to vector<1x384xf32>
    %77 = vector.broadcast %76 : vector<1x384xf32> to vector<2x384xf32>
    %78 = arith.addf %75, %77 : vector<2x384xf32>
    %79 = vector.extract_strided_slice %74 {offsets = [0, 0], sizes = [2, 128], strides = [1, 1]} : vector<2x384xf32> to vector<2x128xf32>
    %80 = vector.extract_strided_slice %78 {offsets = [0, 0], sizes = [2, 128], strides = [1, 1]} : vector<2x384xf32> to vector<2x128xf32>
    %81 = arith.addf %79, %80 : vector<2x128xf32>
    %82 = arith.negf %81 : vector<2x128xf32>
    %83 = math.exp %82 : vector<2x128xf32>
    %cst_31 = arith.constant 1.000000e+00 : f32
    %84 = vector.broadcast %cst_31 : f32 to vector<2x128xf32>
    %85 = arith.addf %84, %83 : vector<2x128xf32>
    %86 = arith.divf %84, %85 : vector<2x128xf32>
    %87 = vector.extract_strided_slice %74 {offsets = [0, 128], sizes = [2, 128], strides = [1, 1]} : vector<2x384xf32> to vector<2x128xf32>
    %88 = vector.extract_strided_slice %78 {offsets = [0, 128], sizes = [2, 128], strides = [1, 1]} : vector<2x384xf32> to vector<2x128xf32>
    %89 = arith.addf %87, %88 : vector<2x128xf32>
    %90 = arith.negf %89 : vector<2x128xf32>
    %91 = math.exp %90 : vector<2x128xf32>
    %cst_32 = arith.constant 1.000000e+00 : f32
    %92 = vector.broadcast %cst_32 : f32 to vector<2x128xf32>
    %93 = arith.addf %92, %91 : vector<2x128xf32>
    %94 = arith.divf %92, %93 : vector<2x128xf32>
    %95 = vector.extract_strided_slice %74 {offsets = [0, 256], sizes = [2, 128], strides = [1, 1]} : vector<2x384xf32> to vector<2x128xf32>
    %96 = vector.extract_strided_slice %78 {offsets = [0, 256], sizes = [2, 128], strides = [1, 1]} : vector<2x384xf32> to vector<2x128xf32>
    %97 = arith.mulf %86, %96 : vector<2x128xf32>
    %98 = arith.addf %95, %97 : vector<2x128xf32>
    %99 = math.tanh %98 : vector<2x128xf32>
    %cst_33 = arith.constant 1.000000e+00 : f32
    %100 = vector.broadcast %cst_33 : f32 to vector<2x128xf32>
    %101 = arith.subf %100, %94 : vector<2x128xf32>
    %102 = arith.mulf %101, %99 : vector<2x128xf32>
    %103 = arith.mulf %94, %2 : vector<2x128xf32>
    %104 = arith.addf %102, %103 : vector<2x128xf32>
    %c0_34 = arith.constant 0 : index
    %c0_35 = arith.constant 0 : index
    %105 = vector.load %arg7[%c0_34, %c0_35] : memref<2x128xf32, #tpu.memory_space<vmem>>, vector<2x128xf32>
    tpu.vector_store %arg7[%c0_34, %c0_35], %104 {strides = array<i32>} : memref<2x128xf32, #tpu.memory_space<vmem>>, vector<2x128xf32>,
    %c0_36 = arith.constant 0 : index
    %c0_37 = arith.constant 0 : index
    %106 = vector.load %arg8[%c0_36, %c0_37] : memref<2x8xf32, #tpu.memory_space<vmem>>, vector<2x8xf32>
    tpu.vector_store %arg8[%c0_36, %c0_37], %45 {strides = array<i32>} : memref<2x8xf32, #tpu.memory_space<vmem>>, vector<2x8xf32>,
    return
  }
  func.func @transform_0(%arg0: i32) -> (i32, i32, i32) {
    %c0_i32 = arith.constant 0 : i32
    %c0_i32_0 = arith.constant 0 : i32
    %c0_i32_1 = arith.constant 0 : i32
    return %arg0, %c0_i32, %c0_i32_0 : i32, i32, i32
  }
  func.func @transform_1(%arg0: i32) -> (i32, i32) {
    %c0_i32 = arith.constant 0 : i32
    %c0_i32_0 = arith.constant 0 : i32
    return %arg0, %c0_i32 : i32, i32
  }
  func.func @transform_2(%arg0: i32) -> (i32, i32) {
    %c0_i32 = arith.constant 0 : i32
    %c0_i32_0 = arith.constant 0 : i32
    return %arg0, %c0_i32 : i32, i32
  }
  func.func @transform_3(%arg0: i32) -> (i32, i32) {
    %c0_i32 = arith.constant 0 : i32
    %c0_i32_0 = arith.constant 0 : i32
    %c0_i32_1 = arith.constant 0 : i32
    return %c0_i32, %c0_i32_0 : i32, i32
  }
  func.func @transform_4(%arg0: i32) -> (i32, i32) {
    %c0_i32 = arith.constant 0 : i32
    %c0_i32_0 = arith.constant 0 : i32
    %c0_i32_1 = arith.constant 0 : i32
    return %c0_i32, %c0_i32_0 : i32, i32
  }
  func.func @transform_5(%arg0: i32) -> (i32, i32) {
    %c0_i32 = arith.constant 0 : i32
    %c0_i32_0 = arith.constant 0 : i32
    %c0_i32_1 = arith.constant 0 : i32
    return %c0_i32, %c0_i32_0 : i32, i32
  }
  func.func @transform_6(%arg0: i32) -> (i32, i32) {
    %c0_i32 = arith.constant 0 : i32
    %c0_i32_0 = arith.constant 0 : i32
    return %arg0, %c0_i32 : i32, i32
  }
  func.func @transform_7(%arg0: i32) -> (i32, i32) {
    %c0_i32 = arith.constant 0 : i32
    %c0_i32_0 = arith.constant 0 : i32
    return %arg0, %c0_i32 : i32, i32
  }
}

</mosaic_0001>

<bundles_post_ra>
// kernel: tpu_custom_call.1
= control target key start
LH: loop header
LB: loop body
LE: loop exit
PB: predicated region body
PF: predicated region fallthrough
CT: control target
= control target key end

     0   :  { %13 = vsyncpa [#allocation3], 0  ;;  %s933_s0 = inlined_call_operand.hbm [shape: f32[2,8,128], index: 0, kind: input, shape index: {}]   ;;  %s934_s1 = inlined_call_operand.hbm [shape: f32[2,8], index: 1, kind: input, shape index: {}]   ;;  %s935_s2 = inlined_call_operand.hbm [shape: f32[2,128], index: 2, kind: input, shape index: {}]   ;;  %s936_s3 = inlined_call_operand.hbm [shape: f32[128,896], index: 3, kind: input, shape index: {}]   ;;  %s937_s4 = inlined_call_operand.hbm [shape: f32[4,128], index: 4, kind: input, shape index: {}]   ;;  %s938_s5 = inlined_call_operand.hbm [shape: f32[2,384], index: 5, kind: input, shape index: {}]   ;;  %s939_s6 = inlined_call_operand.hbm [shape: f32[2,128], index: 6, kind: output, shape index: {0}]   ;;  %s940_s7 = inlined_call_operand.hbm [shape: f32[2,8], index: 7, kind: output, shape index: {1}]  }
   0x1   :  { %14 = vsyncpa [#allocation6], 0 }
   0x2   :  { %15 = vsyncpa [#allocation9], 0 }
   0x3   :  { %16 = vsyncpa [#allocation12], 0 }
   0x4   :  { %17 = vsyncpa [#allocation4], 0  ;;  %s37_s26 = sshll.u32 %s934_s1, 4  ;;  %s38_s26 = int_to_ptr.hbm [resolvable:$true] %s37_s26 }
   0x5   :  { %18 = vsyncpa [#allocation15], 0  ;;  %s825_s27 = smov [#allocation5]   ;;  %s58_s8 = sshll.u32 %s936_s3, 4  ;;  %s59_s8 = int_to_ptr.hbm [resolvable:$true] %s58_s8 }
   0x6   :  { %s39_s28 = sshll.u32 %s825_s27, 4  ;;  %s826_s9 = smov [#allocation8]   ;;  %s40_s28 = int_to_ptr.vmem [resolvable:$true] %s39_s28 }
   0x7   :  { %42 = dma.hbm_to_vmem [thread:$0]  %s38_s26, 32, %s40_s28, [#allocation6]  }
   0x8   :  { %s60_s10 = sshll.u32 %s826_s9, 4  ;;  %s827_s11 = smov 896   ;;  %s61_s10 = int_to_ptr.vmem [resolvable:$true] %s60_s10 }
   0x9   :  { %s828_s12 = smov 56   ;;  %s23_s1 = sshll.u32 %s933_s0, 4  ;;  %s24_s1 = int_to_ptr.hbm [resolvable:$true] %s23_s1 }
   0xa   :  { %66 = dma.hbm_to_vmem [thread:$0]  %s59_s8, 14336, %s61_s10, [#allocation9], %s827_s11, %s827_s11, %s828_s12  }
   0xb   :  { %s829_s15 = smov [#allocation2]   ;;  %s48_s3 = sshll.u32 %s935_s2, 4  ;;  %s49_s3 = int_to_ptr.hbm [resolvable:$true] %s48_s3 }
   0xc   :  { %s25_s16 = sshll.u32 %s829_s15, 4  ;;  %s830_s19 = smov 128   ;;  %s26_s16 = int_to_ptr.vmem [resolvable:$true] %s25_s16 }
   0xd   :  { %s831_s20 = smov 8   ;;  %s832_s21 = smov [#allocation7]  }
   0xe   :  { %31 = dma.hbm_to_vmem [thread:$0]  %s24_s1, 256, %s26_s16, [#allocation3], %s830_s19, %s830_s19, %s831_s20  }
   0xf   :  { %s50_s22 = sshll.u32 %s832_s21, 4  ;;  %s72_s25 = sshll.u32 %s937_s4, 4  ;;  %s51_s22 = int_to_ptr.vmem [resolvable:$true] %s50_s22  ;;  %s73_s25 = int_to_ptr.hbm [resolvable:$true] %s72_s25 }
  0x10   :  { %53 = dma.hbm_to_vmem [thread:$0]  %s49_s3, 32, %s51_s22, [#allocation6]  }
  0x11   :  { %s83_s27 = sshll.u32 %s938_s5, 4  ;;  %s833_s28 = smov [#allocation10]   ;;  %s84_s27 = int_to_ptr.hbm [resolvable:$true] %s83_s27 }
  0x12   :  { %s74_s29 = sshll.u32 %s833_s28, 4  ;;  %s834_s2 = smov [#allocation11]   ;;  %s75_s29 = int_to_ptr.vmem [resolvable:$true] %s74_s29 }
  0x13   :  { %77 = dma.hbm_to_vmem [thread:$0]  %s73_s25, 64, %s75_s29, [#allocation9]  }
  0x14   :  { %s85_s30 = sshll.u32 %s834_s2, 4  ;;  %s86_s30 = int_to_ptr.vmem [resolvable:$true] %s85_s30 }
  0x15   :  { %88 = dma.hbm_to_vmem [thread:$0]  %s84_s27, 96, %s86_s30, [#allocation12]  }
  0x16   :  { %813 = dma.done.wait [#allocation3], 256  }
  0x17   :  { %814 = vsyncadd [#allocation3], 4294967040 }
  0x18   :  { %815 = dma.done.wait [#allocation6], 64  }
  0x19   :  { %816 = vsyncadd [#allocation6], 4294967232 }
  0x1a   :  { %817 = dma.done.wait [#allocation9], 14400  }
  0x1b   :  { %818 = vsyncadd [#allocation9], 4294952896 }
  0x1c   :  { %819 = dma.done.wait [#allocation12], 96  }
  0x1d   :  { %820 = vsyncadd [#allocation12], 4294967200  ;;  %v897_v0 = vld [vmem:[#allocation7] sm:$0x3]  ;;  %v899_v1 = vld [vmem:[#allocation10] sm:$0xf]  ;;  %v274_v27 = vlaneseq }
  0x1e   :  { %v901_v2 = vld [vmem:[#allocation2 + $0x8] sm:$0xff]  ;;  %v231_v3 = vmax.f32 %v897_v0, 0.0  ;;  %v232_v4 = vperm.slane %v899_v1, 0  ;;  %v238_v5 = vperm.slane %v899_v1, 1  ;;  %v253_v6 = vrot.slane %v899_v1, 3  ;;  %v908_v10 = vld [vmem:[#allocation2] sm:$0xff] }
  0x1f   :  { %vm234_vm0 = vcmask 1041408   ;;  %v835_v12 = vmov 0   ;;  %v275_v28 = vand.u32 127, %v274_v27  ;;  %v115_v30 = vld [vmem:[#allocation5] sm:$0x3]  ;;  %vm278_vm3 = vcmask 1041409  }
  0x20   :  { %v233_v7 = vmul.f32 %v232_v4, %v231_v3  ;;  %v240_v8 = vmul.f32 %v238_v5, %v901_v2  ;;  %585 = vpush %v253_v6  ;;  %v239_v11 = vmul.f32 %v238_v5, %v908_v10  ;;  %602 = vset.pattern.permute.xlu2 %v835_v12  ;;  %vm265_vm4 = vcmp.gt.f32.partialorder %v115_v30, 0.0  ;;  %v222_v44 = vld [vmem:[#allocation8 + $0x348] sm:$0xff]  ;;  %v215_v45 = vld [vmem:[#allocation8 + $0x310] sm:$0xff]  ;;  %v208_v46 = vld [vmem:[#allocation8 + $0x2d8] sm:$0xff]  ;;  %s837_s5 = smov [#allocation14]   ;;  %s564_s11 = sshll.u32 %s940_s7, 4  ;;  %s565_s11 = int_to_ptr.hbm [resolvable:$true] %s564_s11 }
  0x21   :  { %601 = vset.pattern.permute.xlu1 %v835_v12  ;;  %vm282_vm5 = vcmask 58368   ;;  %v300_v43 = vshrl.u32 %v274_v27, 7  ;;  %332 = vmatpush.msra.mxu0 %v222_v44  ;;  %v201_v47 = vld [vmem:[#allocation8 + $0x2a0] sm:$0xff]  ;;  %v194_v48 = vld [vmem:[#allocation8 + $0x268] sm:$0xff]  ;;  %v187_v49 = vld [vmem:[#allocation8 + $0x230] sm:$0xff]  ;;  %s562_s8 = sshll.u32 %s837_s5, 4  ;;  %s563_s8 = int_to_ptr.vmem [resolvable:$true] %s562_s8 }
  0x22   :  { %v235_v9 = vsel %vm234_vm0, %v233_v7, 0.0  ;;  %243 = vadd.xlane.f32.xlu1 %v240_v8  ;;  %v180_v50 = vld [vmem:[#allocation8 + $0x1f8] sm:$0xff]  ;;  %v173_v51 = vld [vmem:[#allocation8 + $0x1c0] sm:$0xff]  ;;  %v166_v58 = vld [vmem:[#allocation8 + $0x188] sm:$0xff]  ;;  %s838_s7 = smov [#allocation13]   ;;  %s553_s1 = sshll.u32 %s939_s6, 4  ;;  %s554_s1 = int_to_ptr.hbm [resolvable:$true] %s553_s1 }
  0x23   :  { %236 = vadd.xlane.f32.xlu0 %v235_v9  ;;  %333 = vmatpush.msra.mxu0 %v215_v45  ;;  %v159_v59 = vld [vmem:[#allocation8 + $0x150] sm:$0xff]  ;;  %v152_v60 = vld [vmem:[#allocation8 + $0x118] sm:$0xff]  ;;  %v145_v61 = vld [vmem:[#allocation8 + $0xe0] sm:$0xff]  ;;  %s551_s12 = sshll.u32 %s838_s7, 4  ;;  %s552_s12 = int_to_ptr.vmem [resolvable:$true] %s551_s12 }
  0x24   :  { %603 = vset.pattern.permute.xlu0 %v300_v43  ;;  %v138_v62 = vld [vmem:[#allocation8 + $0xa8] sm:$0xff]  ;;  %v131_v63 = vld [vmem:[#allocation8 + $0x70] sm:$0xff]  ;;  %v124_v3 = vld [vmem:[#allocation8 + $0x38] sm:$0xff] }
  0x25   :  { %334 = vmatpush.msra.mxu0 %v208_v46  ;;  %v117_v4 = vld [vmem:[#allocation8] sm:$0xff]  ;;  %v223_v5 = vld [vmem:[#allocation8 + $0x350] sm:$0xff]  ;;  %v216_v6 = vld [vmem:[#allocation8 + $0x318] sm:$0xff] }
  0x26   :  { %368 = vmatpush.msra.mxu1 %v223_v5  ;;  %v209_v7 = vld [vmem:[#allocation8 + $0x2e0] sm:$0xff]  ;;  %v224_v8 = vld [vmem:[#allocation8 + $0x358] sm:$0xff]  ;;  %v210_v12 = vld [vmem:[#allocation8 + $0x2e8] sm:$0xff] }
  0x27   :  { %335 = vmatpush.msra.mxu0 %v201_v47  ;;  %v217_v9 = vld [vmem:[#allocation8 + $0x320] sm:$0xff]  ;;  %388 = vmatpush.msra.mxu2 %v224_v8  ;;  %v146_v47 = vld [vmem:[#allocation8 + $0xe8] sm:$0xff]  ;;  %v176_v5 = vld [vmem:[#allocation8 + $0x1d8] sm:$0xff] }
  0x28   :  { %369 = vmatpush.msra.mxu1 %v216_v6  ;;  %v197_v27 = vld [vmem:[#allocation8 + $0x280] sm:$0xff]  ;;  %v147_v8 = vld [vmem:[#allocation8 + $0xf0] sm:$0xff] }
  0x29   :  { %336 = vmatpush.msra.mxu0 %v194_v48  ;;  %389 = vmatpush.msra.mxu2 %v217_v9  ;;  %v161_v46 = vld [vmem:[#allocation8 + $0x160] sm:$0xff] }
  0x2a   :  { %370 = vmatpush.msra.mxu1 %v209_v7  ;;  %v177_v6 = vld [vmem:[#allocation8 + $0x1e0] sm:$0xff]  ;;  %v206_v7 = vld [vmem:[#allocation8 + $0x2c8] sm:$0xff] }
  0x2b   :  { %241 = vadd.xlane.f32.xlu0 %v239_v11  ;;  %337 = vmatpush.msra.mxu0 %v187_v49  ;;  %v202_v11 = vld [vmem:[#allocation8 + $0x2a8] sm:$0xff]  ;;  %v169_v9 = vld [vmem:[#allocation8 + $0x1a0] sm:$0xff] }
  0x2c   :  { %371 = vmatpush.msra.mxu1 %v202_v11  ;;  %390 = vmatpush.msra.mxu2 %v210_v12  ;;  %v170_v11 = vld [vmem:[#allocation8 + $0x1a8] sm:$0xff]  ;;  %v199_v12 = vld [vmem:[#allocation8 + $0x290] sm:$0xff] }
  0x2d   :  { %338 = vmatpush.msra.mxu0 %v180_v50  ;;  %v154_v50 = vld [vmem:[#allocation8 + $0x128] sm:$0xff] }
  0x2f   :  { %339 = vmatpush.msra.mxu0 %v173_v51 }
  0x31   :  { %340 = vmatpush.msra.mxu0 %v166_v58 }
  0x33   :  { %341 = vmatpush.msra.mxu0 %v159_v59  ;;  %v118_v59 = vld [vmem:[#allocation8 + $0x8] sm:$0xff] }
  0x35   :  { %342 = vmatpush.msra.mxu0 %v152_v60 }
  0x37   :  { %343 = vmatpush.msra.mxu0 %v145_v61 }
  0x39   :  { %344 = vmatpush.msra.mxu0 %v138_v62  ;;  %v227_v62 = vld [vmem:[#allocation8 + $0x370] sm:$0xff] }
  0x3b   :  { %345 = vmatpush.msra.mxu0 %v131_v63 }
  0x3d   :  { %346 = vmatpush.msra.mxu0 %v124_v3  ;;  %v220_v3 = vld [vmem:[#allocation8 + $0x338] sm:$0xff] }
  0x3f   :  { %347 = vmatpush.msra.mxu0 %v117_v4  ;;  %v213_v4 = vld [vmem:[#allocation8 + $0x300] sm:$0xff] }
  0x51   :  { %s586_s4 = spop %585 }
  0x52   :  { %v255_v16 = vstv %s586_s4 }
  0x95   :  { %v244_v14 = vpop.xlane.xlu1 %243 }
  0x96   :  { %v237_v13 = vpop.xlane.xlu0 %236 }
  0x97   :  { %v247_v15 = vperm.slane %v237_v13, 1  ;;  %v246_v19 = vperm.slane %v237_v13, 0  ;;  %v225_v13 = vld [vmem:[#allocation8 + $0x360] sm:$0xff] }
  0x98   :  { %408 = vmatpush.msra.mxu3 %v225_v13  ;;  %v140_v13 = vld [vmem:[#allocation8 + $0xb8] sm:$0xff] }
  0x99   :  { %v251_v17 = vadd.f32 %v247_v15, %v244_v14  ;;  %v226_v14 = vld [vmem:[#allocation8 + $0x368] sm:$0xff]  ;;  %v195_v15 = vld [vmem:[#allocation8 + $0x270] sm:$0xff] }
  0x9a   :  { %437 = vmatpush.msrb.mxu0 %v226_v14  ;;  %372 = vmatpush.msra.mxu1 %v195_v15  ;;  %v162_v14 = vld [vmem:[#allocation8 + $0x168] sm:$0xff]  ;;  %v163_v15 = vld [vmem:[#allocation8 + $0x170] sm:$0xff] }
  0x9b   :  { %v258_v18 = vadd.f32 %v255_v16, %v251_v17  ;;  %v203_v17 = vld [vmem:[#allocation8 + $0x2b0] sm:$0xff] }
  0x9c   :  { %391 = vmatpush.msra.mxu2 %v203_v17  ;;  %v133_v17 = vld [vmem:[#allocation8 + $0x80] sm:$0xff] }
  0x9d   :  { %vm260_vm1 = vcmp.gt.f32.partialorder %v258_v18, 0.0  ;;  %v262_v20 = vmul.f32 0.01, %v258_v18 }
  0x9e   :  { %v242_v21 = vpop.xlane.xlu0 %241 }
  0x9f   :  { %v250_v22 = vadd.f32 %v246_v19, %v242_v21  ;;  %v264_v23 = vsel %vm260_vm1, %v258_v18, %v262_v20  ;;  %v219_v18 = vld [vmem:[#allocation8 + $0x330] sm:$0xff]  ;;  %v188_v19 = vld [vmem:[#allocation8 + $0x238] sm:$0xff] }
  0xa0   :  { %272 = vperm.xlu2 %602, %v264_v23   ;;  %v211_v20 = vld [vmem:[#allocation8 + $0x2f0] sm:$0xff]  ;;  %v212_v21 = vld [vmem:[#allocation8 + $0x2f8] sm:$0xff]  ;;  %438 = vmatpush.msrb.mxu0 %v219_v18 }
  0xa1   :  { %v257_v24 = vadd.f32 %v255_v16, %v250_v22  ;;  %v218_v16 = vld [vmem:[#allocation8 + $0x328] sm:$0xff]  ;;  %v196_v22 = vld [vmem:[#allocation8 + $0x278] sm:$0xff]  ;;  %373 = vmatpush.msra.mxu1 %v188_v19  ;;  %v155_v18 = vld [vmem:[#allocation8 + $0x130] sm:$0xff] }
  0xa2   :  { %409 = vmatpush.msra.mxu3 %v218_v16  ;;  %v204_v23 = vld [vmem:[#allocation8 + $0x2b8] sm:$0xff]  ;;  %439 = vmatpush.msrb.mxu0 %v212_v21  ;;  %v126_v21 = vld [vmem:[#allocation8 + $0x48] sm:$0xff] }
  0xa3   :  { %vm259_vm2 = vcmp.gt.f32.partialorder %v257_v24, 0.0  ;;  %v261_v25 = vmul.f32 0.01, %v257_v24  ;;  %392 = vmatpush.msra.mxu2 %v196_v22  ;;  %v192_v16 = vld [vmem:[#allocation8 + $0x258] sm:$0xff] }
  0xa4   :  { %410 = vmatpush.msra.mxu3 %v211_v20  ;;  %v156_v19 = vld [vmem:[#allocation8 + $0x138] sm:$0xff]  ;;  %v185_v20 = vld [vmem:[#allocation8 + $0x220] sm:$0xff] }
  0xa5   :  { %v263_v26 = vsel %vm259_vm2, %v257_v24, %v261_v25  ;;  %v181_v24 = vld [vmem:[#allocation8 + $0x200] sm:$0xff]  ;;  %v148_v22 = vld [vmem:[#allocation8 + $0xf8] sm:$0xff] }
  0xa6   :  { %269 = vperm.xlu1 %601, %v263_v26   ;;  %v205_v25 = vld [vmem:[#allocation8 + $0x2c0] sm:$0xff]  ;;  %411 = vmatpush.msra.mxu3 %v204_v23 }
  0xa7   :  { %v189_v26 = vld [vmem:[#allocation8 + $0x240] sm:$0xff]  ;;  %374 = vmatpush.msra.mxu1 %v181_v24  ;;  %440 = vmatpush.msrb.mxu0 %v205_v25  ;;  %v178_v24 = vld [vmem:[#allocation8 + $0x1e8] sm:$0xff]  ;;  %v119_v25 = vld [vmem:[#allocation8 + $0x10] sm:$0xff] }
  0xa8   :  { %393 = vmatpush.msra.mxu2 %v189_v26  ;;  %412 = vmatpush.msra.mxu3 %v197_v27  ;;  %v149_v23 = vld [vmem:[#allocation8 + $0x100] sm:$0xff]  ;;  %v142_v27 = vld [vmem:[#allocation8 + $0xc8] sm:$0xff] }
  0xa9   :  { %v141_v26 = vld [vmem:[#allocation8 + $0xc0] sm:$0xff] }
  0xae   :  { %604 = vset.pattern.permute.xlu1 %v300_v43  ;;  %v153_v43 = vld [vmem:[#allocation8 + $0x120] sm:$0xff] }
  0xfa   :  { %v273_v29 = vpop.permute.xlu2 %272 }
  0xfb   :  { %v277_v32 = vperm.slane %v273_v29, %v275_v28  ;;  %v198_v29 = vld [vmem:[#allocation8 + $0x288] sm:$0xff] }
  0xfc   :  { %441 = vmatpush.msrb.mxu0 %v198_v29  ;;  %v228_v29 = vld [vmem:[#allocation8 + $0x378] sm:$0xff] }
 0x118   :  { %v270_v31 = vpop.permute.xlu1 %269 }
 0x119   :  { %v276_v33 = vperm.slane %v270_v31, %v275_v28  ;;  %v174_v28 = vld [vmem:[#allocation8 + $0x1c8] sm:$0xff] }
 0x11a   :  { %v190_v31 = vld [vmem:[#allocation8 + $0x248] sm:$0xff]  ;;  %375 = vmatpush.msra.mxu1 %v174_v28  ;;  %v171_v28 = vld [vmem:[#allocation8 + $0x1b0] sm:$0xff] }
 0x11b   :  { %v279_v34 = vsel %vm278_vm3, %v277_v32, %v276_v33  ;;  %v167_v32 = vld [vmem:[#allocation8 + $0x190] sm:$0xff]  ;;  %413 = vmatpush.msra.mxu3 %v190_v31 }
 0x11c   :  { %v281_v35 = vsel %vm265_vm4, %v279_v34, -1e+30  ;;  %v191_v33 = vld [vmem:[#allocation8 + $0x250] sm:$0xff]  ;;  %376 = vmatpush.msra.mxu1 %v167_v32  ;;  %v164_v32 = vld [vmem:[#allocation8 + $0x178] sm:$0xff] }
 0x11d   :  { %v283_v36 = vsel %vm282_vm5, %v281_v35, -inf  ;;  %v175_v34 = vld [vmem:[#allocation8 + $0x1d0] sm:$0xff]  ;;  %442 = vmatpush.msrb.mxu0 %v191_v33  ;;  %v221_v33 = vld [vmem:[#allocation8 + $0x340] sm:$0xff] }
 0x11e   :  { %284 = vmax.xlane.f32.xlu2 %v283_v36  ;;  %v135_v31 = vld [vmem:[#allocation8 + $0x90] sm:$0xff] }
 0x191   :  { %v285_v37 = vpop.xlane.xlu2 %284 }
 0x192   :  { %v286_v38 = vsub.f32 %v281_v35, %v285_v37  ;;  %v183_v35 = vld [vmem:[#allocation8 + $0x210] sm:$0xff] }
 0x193   :  { %414 = vmatpush.msra.mxu3 %v183_v35  ;;  %v128_v35 = vld [vmem:[#allocation8 + $0x58] sm:$0xff] }
 0x194   :  { %v287_v39 = vmul.f32 1.442695, %v286_v38  ;;  %v160_v38 = vld [vmem:[#allocation8 + $0x158] sm:$0xff] }
 0x195   :  { %377 = vmatpush.msra.mxu1 %v160_v38  ;;  %415 = vmatpush.msra.mxu3 %v176_v5  ;;  %v120_v38 = vld [vmem:[#allocation8 + $0x18] sm:$0xff]  ;;  %v230_v5 = vld [vmem:[#allocation11] sm:$0x3f] }
 0x196   :  { %605 = vpow2.f32 %v287_v39  ;;  %v184_v39 = vld [vmem:[#allocation8 + $0x218] sm:$0xff] }
 0x197   :  { %443 = vmatpush.msrb.mxu0 %v184_v39  ;;  %378 = vmatpush.msra.mxu1 %v153_v43  ;;  %v121_v39 = vld [vmem:[#allocation8 + $0x20] sm:$0xff]  ;;  %v200_v43 = vld [vmem:[#allocation8 + $0x298] sm:$0xff] }
 0x198   :  { %416 = vmatpush.msra.mxu3 %v169_v9 }
 0x199   :  { %379 = vmatpush.msra.mxu1 %v146_v47  ;;  %444 = vmatpush.msrb.mxu0 %v177_v6  ;;  %v186_v47 = vld [vmem:[#allocation8 + $0x228] sm:$0xff]  ;;  %v428_v6 = vperm.slane %v230_v5, 1 }
 0x19a   :  { %417 = vmatpush.msra.mxu3 %v162_v14 }
 0x19b   :  { %445 = vmatpush.msrb.mxu0 %v170_v11 }
 0x19c   :  { %v606_v40 = vpop.eup %605  ;;  %418 = vmatpush.msra.mxu3 %v155_v18 }
 0x19d   :  { %v289_v41 = vmul.f32 %v606_v40, %v115_v30  ;;  %v182_v30 = vld [vmem:[#allocation8 + $0x208] sm:$0xff]  ;;  %446 = vmatpush.msrb.mxu0 %v163_v15  ;;  %v360_v15 = vperm.slane %v230_v5, 2 }
 0x19e   :  { %394 = vmatpush.msra.mxu2 %v182_v30  ;;  %419 = vmatpush.msra.mxu3 %v148_v22  ;;  %v134_v30 = vld [vmem:[#allocation8 + $0x88] sm:$0xff] }
 0x19f   :  { %v290_v42 = vsel %vm282_vm5, %v289_v41, 0.0  ;;  %447 = vmatpush.msrb.mxu0 %v156_v19  ;;  %v366_v19 = vperm.slane %v360_v15, 0 }
 0x1a0   :  { %291 = vadd.xlane.f32.xlu0 %v290_v42  ;;  %v168_v42 = vld [vmem:[#allocation8 + $0x198] sm:$0xff]  ;;  %395 = vmatpush.msra.mxu2 %v175_v34  ;;  %v127_v34 = vld [vmem:[#allocation8 + $0x50] sm:$0xff] }
 0x1a1   :  { %448 = vmatpush.msrb.mxu0 %v149_v23  ;;  %420 = vmatpush.msra.mxu3 %v141_v26 }
 0x1a2   :  { %396 = vmatpush.msra.mxu2 %v168_v42  ;;  %v143_v42 = vld [vmem:[#allocation8 + $0xd0] sm:$0xff] }
 0x1a3   :  { %449 = vmatpush.msrb.mxu0 %v142_v27  ;;  %421 = vmatpush.msra.mxu3 %v134_v30  ;;  %v430_v30 = vperm.slane %v230_v5, 5 }
 0x1a4   :  { %397 = vmatpush.msra.mxu2 %v161_v46  ;;  %v129_v46 = vld [vmem:[#allocation8 + $0x60] sm:$0xff] }
 0x1a5   :  { %450 = vmatpush.msrb.mxu0 %v135_v31  ;;  %422 = vmatpush.msra.mxu3 %v127_v34  ;;  %v361_v34 = vperm.slane %v230_v5, 4 }
 0x1a6   :  { %398 = vmatpush.msra.mxu2 %v154_v50  ;;  %v172_v50 = vld [vmem:[#allocation8 + $0x1b8] sm:$0xff] }
 0x1a7   :  { %451 = vmatpush.msrb.mxu0 %v128_v35  ;;  %423 = vmatpush.msra.mxu3 %v120_v38  ;;  %v436_v35 = vperm.slane %v430_v30, 1 }
 0x1a8   :  { %399 = vmatpush.msra.mxu2 %v147_v8  ;;  %v434_v8 = vperm.slane %v428_v6, 1 }
 0x1a9   :  { %452 = vmatpush.msrb.mxu0 %v121_v39 }
 0x1aa   :  { %400 = vmatpush.msra.mxu2 %v140_v13 }
 0x1ac   :  { %401 = vmatpush.msra.mxu2 %v133_v17 }
 0x1ae   :  { %402 = vmatpush.msra.mxu2 %v126_v21 }
 0x1b0   :  { %403 = vmatpush.msra.mxu2 %v119_v25 }
 0x1b2   :  { %477 = vmatpush.msrb.mxu2 %v228_v29 }
 0x1b4   :  { %478 = vmatpush.msrb.mxu2 %v221_v33 }
 0x213   :  { %v914_v52 = vpop.xlane.xlu0 %291 }
 0x214   :  { %v293_v53 = vmax.f32 %v914_v52, 1e-30  ;;  %vm296_vm6 = vcmp.gt.f32.partialorder %v914_v52, 0.0 }
 0x216   :  { %607 = vrcp.f32 %v293_v53  ;;  %v132_v53 = vld [vmem:[#allocation8 + $0x78] sm:$0xff] }
 0x21c   :  { %v608_v54 = vpop.eup %607 }
 0x21d   :  { %v295_v55 = vmul.f32 %v608_v54, %v289_v41 }
 0x21f   :  { %v305_v56 = vperm.slane %v295_v55, 1  ;;  %545 = vst.msk [vmem:[#allocation14] sm:$0x3] %vm282_vm5, %v295_v55  ;;  %v298_v57 = vperm.slane %v295_v55, 0 }
 0x220   :  { %567 = dma.vmem_to_hbm [thread:$0]  %s563_s8, 32, %s565_s11, [#allocation15]  }
 0x221   :  { %310 = vperm.xlu1 %604, %v305_v56   ;;  %303 = vperm.xlu0 %603, %v298_v57   ;;  %v125_v56 = vld [vmem:[#allocation8 + $0x40] sm:$0xff] }
 0x293   :  { %v311_v36 = vpop.permute.xlu1 %310  ;;  %v304_v37 = vpop.permute.xlu0 %303 }
 0x294   :  { %v313_v40 = vmul.f32 %v311_v36, %v901_v2  ;;  %v312_v41 = vmul.f32 %v304_v37, %v908_v10  ;;  %v139_v2 = vld [vmem:[#allocation8 + $0xb0] sm:$0xff]  ;;  %v157_v36 = vld [vmem:[#allocation8 + $0x140] sm:$0xff]  ;;  %v214_v37 = vld [vmem:[#allocation8 + $0x308] sm:$0xff] }
 0x295   :  { %380 = vmatpush.msra.mxu1 %v139_v2  ;;  %479 = vmatpush.msrb.mxu2 %v214_v37  ;;  %v165_v2 = vld [vmem:[#allocation8 + $0x180] sm:$0xff] }
 0x296   :  { %v320_v44 = vrot.slane %v313_v40, 4  ;;  %v314_v45 = vrot.slane %v312_v41, 4 }
 0x297   :  { %381 = vmatpush.msra.mxu1 %v132_v53 }
 0x298   :  { %v321_v48 = vadd.f32 %v320_v44, %v313_v40  ;;  %v315_v49 = vadd.f32 %v314_v45, %v312_v41  ;;  %v150_v40 = vld [vmem:[#allocation8 + $0x108] sm:$0xff]  ;;  %v207_v41 = vld [vmem:[#allocation8 + $0x2d0] sm:$0xff]  ;;  %v136_v44 = vld [vmem:[#allocation8 + $0x98] sm:$0xff] }
 0x299   :  { %382 = vmatpush.msra.mxu1 %v125_v56  ;;  %480 = vmatpush.msrb.mxu2 %v207_v41  ;;  %v193_v45 = vld [vmem:[#allocation8 + $0x260] sm:$0xff]  ;;  %v367_v41 = vperm.slane %v361_v34, 0 }
 0x29a   :  { %v322_v10 = vrot.slane %v321_v48, 2  ;;  %v316_v51 = vrot.slane %v315_v49, 2 }
 0x29b   :  { %383 = vmatpush.msra.mxu1 %v118_v59  ;;  %481 = vmatpush.msrb.mxu2 %v200_v43 }
 0x29c   :  { %v323_v54 = vadd.f32 %v322_v10, %v321_v48  ;;  %v317_v55 = vadd.f32 %v316_v51, %v315_v49  ;;  %v122_v48 = vld [vmem:[#allocation8 + $0x28] sm:$0xff]  ;;  %v179_v49 = vld [vmem:[#allocation8 + $0x1f0] sm:$0xff]  ;;  %v326_v10 = vperm.slane %v899_v1, 2  ;;  %v836_v51 = vmov 0.0  }
 0x29d   :  { %457 = vmatpush.msrb.mxu1 %v227_v62  ;;  %482 = vmatpush.msrb.mxu2 %v193_v45  ;;  %v297_v53 = vsel %vm296_vm6, 1.0, %v836_v51 }
 0x29e   :  { %v324_v57 = vrot.slane %v323_v54, 1  ;;  %v318_v58 = vrot.slane %v317_v55, 1  ;;  %v327_v56 = vmul.f32 %v326_v10, %v297_v53 }
 0x29f   :  { %458 = vmatpush.msrb.mxu1 %v220_v3  ;;  %483 = vmatpush.msrb.mxu2 %v186_v47 }
 0x2a0   :  { %v319_v60 = vadd.f32 %v318_v58, %v317_v55  ;;  %v325_v61 = vadd.f32 %v324_v57, %v323_v54  ;;  %v158_v54 = vld [vmem:[#allocation8 + $0x148] sm:$0xff]  ;;  %v151_v55 = vld [vmem:[#allocation8 + $0x110] sm:$0xff]  ;;  %v144_v58 = vld [vmem:[#allocation8 + $0xd8] sm:$0xff] }
 0x2a1   :  { %459 = vmatpush.msrb.mxu1 %v213_v4  ;;  %484 = vmatpush.msrb.mxu2 %v179_v49 }
 0x2a2   :  { %v330_v63 = vsel %vm278_vm3, %v325_v61, %v319_v60  ;;  %v137_v60 = vld [vmem:[#allocation8 + $0xa0] sm:$0xff]  ;;  %v130_v61 = vld [vmem:[#allocation8 + $0x68] sm:$0xff] }
 0x2a3   :  { %348 = vmatmul.f32.vlgmr.msra.gmra.mxu0 %v330_v63  ;;  %460 = vmatpush.msrb.mxu1 %v206_v7  ;;  %v123_v63 = vld [vmem:[#allocation8 + $0x30] sm:$0xff]  ;;  %v359_v7 = vperm.slane %v230_v5, 0 }
 0x2a4   :  { %485 = vmatpush.msrb.mxu2 %v172_v50 }
 0x2a5   :  { %461 = vmatpush.msrb.mxu1 %v199_v12  ;;  %v365_v11 = vperm.slane %v359_v7, 0 }
 0x2a6   :  { %486 = vmatpush.msrb.mxu2 %v165_v2 }
 0x2a7   :  { %462 = vmatpush.msrb.mxu1 %v192_v16  ;;  %v429_v16 = vperm.slane %v230_v5, 3 }
 0x2a8   :  { %487 = vmatpush.msrb.mxu2 %v158_v54 }
 0x2a9   :  { %463 = vmatpush.msrb.mxu1 %v185_v20  ;;  %v435_v20 = vperm.slane %v429_v16, 1 }
 0x2aa   :  { %488 = vmatpush.msrb.mxu2 %v151_v55 }
 0x2ab   :  { %464 = vmatpush.msrb.mxu1 %v178_v24  ;;  %453 = vmatmul.f32.vlgmr.msrb.gmra.mxu0 %v897_v0 }
 0x2ac   :  { %489 = vmatpush.msrb.mxu2 %v144_v58 }
 0x2ad   :  { %465 = vmatpush.msrb.mxu1 %v171_v28 }
 0x2ae   :  { %490 = vmatpush.msrb.mxu2 %v137_v60 }
 0x2af   :  { %466 = vmatpush.msrb.mxu1 %v164_v32 }
 0x2b0   :  { %491 = vmatpush.msrb.mxu2 %v130_v61 }
 0x2b1   :  { %467 = vmatpush.msrb.mxu1 %v157_v36 }
 0x2b2   :  { %492 = vmatpush.msrb.mxu2 %v123_v63 }
 0x2b3   :  { %468 = vmatpush.msrb.mxu1 %v150_v40 }
 0x2b5   :  { %469 = vmatpush.msrb.mxu1 %v143_v42 }
 0x2b7   :  { %470 = vmatpush.msrb.mxu1 %v136_v44 }
 0x2b9   :  { %471 = vmatpush.msrb.mxu1 %v129_v46 }
 0x2bb   :  { %472 = vmatpush.msrb.mxu1 %v122_v48 }
 0x320   :  { %v349_v57 = vpop.f32.mrf.mxu0 }
 0x321   :  { %v350_v59 = vadd.f32 %v349_v57, %v327_v56 }
 0x323   :  { %v353_v52 = vmin.f32 %v350_v59, 0.0  ;;  %vm352_vm7 = vcmp.gt.f32.partialorder %v350_v59, 0.0 }
 0x325   :  { %v354_v62 = vmul.f32 1.442695, %v353_v52 }
 0x327   :  { %609 = vpow2.f32 %v354_v62 }
 0x328   :  { %v454_v9 = vpop.f32.mrf.mxu0 }
 0x329   :  { %v455_v12 = vadd.f32 %v454_v9, %v434_v8 }
 0x32d   :  { %v610_v1 = vpop.eup %609 }
 0x32e   :  { %v582_v3 = vadd.f32 -1.0, %v610_v1 }
 0x330   :  { %v357_v4 = vsel %vm352_vm7, %v350_v59, %v582_v3 }
 0x331   :  { %384 = vmatmul.f32.vlgmr.msra.gmra.mxu1 %v357_v4  ;;  %404 = vmatmul.f32.vlgmr.msra.gmra.mxu2 %v357_v4 }
 0x332   :  { %424 = vmatmul.f32.vlgmr.msra.gmra.mxu3 %v357_v4 }
 0x339   :  { %473 = vmatmul.f32.vlgmr.msrb.gmra.mxu1 %v897_v0  ;;  %493 = vmatmul.f32.vlgmr.msrb.gmra.mxu2 %v897_v0 }
 0x3ae   :  { %v385_v13 = vpop.f32.mrf.mxu1 }
 0x3af   :  { %v386_v14 = vadd.f32 %v385_v13, %v365_v11 }
 0x3b1   :  { %v497_v17 = vadd.f32 %v455_v12, %v386_v14 }
 0x3b3   :  { %v583_v18 = vmul.f32 -1.442695, %v497_v17 }
 0x3b4   :  { %v405_v21 = vpop.f32.mrf.mxu2 }
 0x3b5   :  { %611 = vpow2.f32 %v583_v18  ;;  %v406_v23 = vadd.f32 %v405_v21, %v366_v19  ;;  %v425_v45 = vpop.f32.mrf.mxu3 }
 0x3b6   :  { %v474_v22 = vpop.f32.mrf.mxu1  ;;  %v426_v50 = vadd.f32 %v425_v45, %v367_v41 }
 0x3b7   :  { %v475_v24 = vadd.f32 %v474_v22, %v435_v20 }
 0x3b9   :  { %v517_v25 = vadd.f32 %v475_v24, %v406_v23 }
 0x3bb   :  { %v612_v26 = vpop.eup %611  ;;  %v584_v27 = vmul.f32 -1.442695, %v517_v25 }
 0x3bc   :  { %v501_v28 = vadd.f32 1.0, %v612_v26  ;;  %v494_v37 = vpop.f32.mrf.mxu2 }
 0x3bd   :  { %613 = vpow2.f32 %v584_v27  ;;  %v495_v42 = vadd.f32 %v494_v37, %v436_v35 }
 0x3be   :  { %615 = vrcp.f32 %v501_v28  ;;  %v513_v38 = vand.u32 2147483648, %v501_v28  ;;  %v511_v40 = vand.u32 2147483647, %v501_v28  ;;  %vm507_vm9 = vweird.f32 %v501_v28 }
 0x3c0   :  { %v514_v46 = vor.u32 1.1754944e-38, %v513_v38  ;;  %vm512_vm11 = vcmp.eq.f32.partialorder %v511_v40, 8.507059e+37 }
 0x3c3   :  { %v614_v29 = vpop.eup %613 }
 0x3c4   :  { %v616_v31 = vpop.eup %615  ;;  %v521_v32 = vadd.f32 1.0, %v614_v29 }
 0x3c5   :  { %v503_v33 = vmul.f32 %v616_v31, %v501_v28  ;;  %vm508_vm8 = vweird.f32 %v616_v31 }
 0x3c6   :  { %617 = vrcp.f32 %v521_v32  ;;  %vm509_vm10 = vmor %vm507_vm9, %vm508_vm8  ;;  %v533_v51 = vand.u32 2147483648, %v521_v32  ;;  %v531_v55 = vand.u32 2147483647, %v521_v32  ;;  %vm527_vm13 = vweird.f32 %v521_v32 }
 0x3c7   :  { %v504_v36 = vsub.f32 1.0, %v503_v33 }
 0x3c8   :  { %v534_v57 = vor.u32 1.1754944e-38, %v533_v51  ;;  %vm532_vm15 = vcmp.eq.f32.partialorder %v531_v55, 8.507059e+37 }
 0x3c9   :  { %v505_v39 = vmul.f32 %v616_v31, %v504_v36 }
 0x3cb   :  { %v506_v43 = vadd.f32 %v616_v31, %v505_v39 }
 0x3cc   :  { %v618_v44 = vpop.eup %617 }
 0x3cd   :  { %v523_v47 = vmul.f32 %v618_v44, %v521_v32  ;;  %v510_v48 = vsel %vm509_vm10, %v616_v31, %v506_v43  ;;  %vm528_vm12 = vweird.f32 %v618_v44 }
 0x3ce   :  { %v515_v49 = vsel %vm512_vm11, %v514_v46, %v510_v48  ;;  %vm529_vm14 = vmor %vm527_vm13, %vm528_vm12 }
 0x3cf   :  { %v524_v2 = vsub.f32 1.0, %v523_v47  ;;  %v537_v10 = vmul.f32 %v515_v49, %v495_v42 }
 0x3d1   :  { %v538_v53 = vadd.f32 %v537_v10, %v426_v50  ;;  %v525_v54 = vmul.f32 %v618_v44, %v524_v2 }
 0x3d3   :  { %619 = vtanh.f32 %v538_v53  ;;  %v526_v56 = vadd.f32 %v618_v44, %v525_v54 }
 0x3d5   :  { %v530_v58 = vsel %vm529_vm14, %v618_v44, %v526_v56 }
 0x3d6   :  { %v535_v59 = vsel %vm532_vm15, %v534_v57, %v530_v58 }
 0x3d7   :  { %v540_v60 = vsub.f32 1.0, %v535_v59  ;;  %v542_v62 = vmul.f32 %v535_v59, %v897_v0 }
 0x3d9   :  { %v620_v52 = vpop.eup %619 }
 0x3da   :  { %v541_v61 = vmul.f32 %v620_v52, %v540_v60 }
 0x3dc   :  { %v543_v63 = vadd.f32 %v542_v62, %v541_v61 }
 0x3de   :  { %544 = vst [vmem:[#allocation13] sm:$0x3] %v543_v63 }
 0x3df   :  { %556 = dma.vmem_to_hbm [thread:$0]  %s552_s12, 32, %s554_s1, [#allocation4]  }
 0x3e0   :  { %821 = dma.done.wait [#allocation4], 32  }
 0x3e1   :  { %822 = vsyncadd [#allocation4], 4294967264 }
 0x3e2   :  { %823 = dma.done.wait [#allocation15], 32  }
 0x3e3   :  { %824 = vsyncadd [#allocation15], 4294967264 }
 0x3e4   :  { %576 = vsyncpa [#allocation3], 1 }
 0x3e5   :  { %577 = vsyncpa [#allocation6], 1 }
 0x3e6   :  { %578 = vsyncpa [#allocation9], 1 }
 0x3e7   :  { %579 = vsyncpa [#allocation12], 1 }
 0x3e8   :  { %580 = vsyncpa [#allocation4], 1 }
 0x3e9   :  { %581 = vsyncpa [#allocation15], 1 }

</bundles_post_ra>
